<compile_context>
chip_gen: v5e
topology: v5e:2x2
jax: 0.10.0
libtpu: 0.0.40
codegen_flags: <defaults>
</compile_context>

<pallas_src>
import jax
import jax.numpy as jnp
from jax import lax
from jax.experimental import pallas as pl
from jax.experimental.pallas import tpu as pltpu


_SUBLANE = 8
_LANE = 128
_LANE_TILE_BUDGET = 8192  # lanes per grid step once the problem is large


def _round_up(x, m):
    return (x + m - 1) // m * m


def _conv_matmul_kernel(p_ref, w_ref, b_ref, o_ref):
    # p_ref : (K_pad, T)        im2col patch columns for this lane tile
    # w_ref : (Cout_pad, K_pad) conv weights, zero-padded, VMEM resident
    # b_ref : (Cout_pad, 1)     bias column, broadcast along lanes
    # o_ref : (Cout_pad, T)     lane-dense output slab
    acc = jnp.dot(
        w_ref[...],
        p_ref[...],
        preferred_element_type=jnp.float32,
        precision=lax.Precision.HIGHEST,
    )
    o_ref[...] = (acc + b_ref[...]).astype(o_ref.dtype)


def _im2col(x_nchw, KH, KW):
    """(N, Cin, H, W) -> (K, N*Hout*Wout), K ordered (ci, kh, kw) to match OIHW.
    Each shifted window is extracted exactly once (layout plumbing, fused by XLA)."""
    N, Cin, H, W = x_nchw.shape
    Hout, Wout = H - KH + 1, W - KW + 1
    planes = []
    for ci in range(Cin):
        for kh in range(KH):
            for kw in range(KW):
                planes.append(x_nchw[:, ci, kh:kh + Hout, kw:kw + Wout])  # (N,Hout,Wout)
    patches = jnp.stack(planes, axis=0)                       # (K, N, Hout, Wout)
    return patches.reshape(Cin * KH * KW, N * Hout * Wout)    # lane order = (n, hw)


def conv2d_pallas(x_nchw, weight_oihw, bias, *, stride=1, padding=0):
    """Forward of DemoNN: y = Conv2d(3, 6, 3)(x), NCHW in / NCHW out."""
    assert stride == 1 and padding == 0, "DemoNN's conv1 is stride=1, padding=0"
    N, Cin, H, W = x_nchw.shape
    Cout, Cin_w, KH, KW = weight_oihw.shape
    assert Cin == Cin_w
    Hout, Wout = H - KH + 1, W - KW + 1
    K, HW = Cin * KH * KW, Hout * Wout
    L = N * HW

    # Hardware-friendly padded extents.
    K_pad = _round_up(K, _SUBLANE)
    Cout_pad = _round_up(Cout, _SUBLANE)
    if L <= _LANE_TILE_BUDGET:
        tile = _round_up(L, _LANE)       # single grid step for small batches
        L_pad = tile
    else:
        tile = _LANE_TILE_BUDGET         # 128-aligned lane tiles
        L_pad = _round_up(L, tile)       # grid divides evenly, no ragged edge
    num_tiles = L_pad // tile

    patches = _im2col(x_nchw, KH, KW)                               # (K, L)
    patches = jnp.pad(patches, ((0, K_pad - K), (0, L_pad - L)))    # (K_pad, L_pad)
    w_mat = jnp.pad(weight_oihw.reshape(Cout, K),
                    ((0, Cout_pad - Cout), (0, K_pad - K)))         # (Cout_pad, K_pad)
    b_col = jnp.pad(bias.reshape(Cout, 1),
                    ((0, Cout_pad - Cout), (0, 0)))                 # (Cout_pad, 1)

    out_flat = pl.pallas_call(
        _conv_matmul_kernel,
        out_shape=jax.ShapeDtypeStruct((Cout_pad, L_pad), x_nchw.dtype),
        grid=(num_tiles,),
        in_specs=[
            # One lane tile of the batched patch matrix per grid step.
            pl.BlockSpec((K_pad, tile), lambda i: (0, i)),
            # Weights / bias: tiny, VMEM resident across all steps.
            pl.BlockSpec((Cout_pad, K_pad), lambda i: (0, 0)),
            pl.BlockSpec((Cout_pad, 1), lambda i: (0, 0)),
        ],
        out_specs=pl.BlockSpec((Cout_pad, tile), lambda i: (0, i)),
        compiler_params=pltpu.CompilerParams(
            dimension_semantics=("parallel",),
        ),
    )(patches, w_mat, b_col)

    out = out_flat[:Cout, :L]                         # drop channel / lane padding
    out = out.reshape(Cout, N, Hout, Wout)
    return jnp.transpose(out, (1, 0, 2, 3))           # -> (N, Cout, Hout, Wout)


if __name__ == "__main__":
    key = jax.random.PRNGKey(0)
    k_x, k_w, k_b = jax.random.split(key, 3)

    # DemoNN shapes: Conv2d(3, 6, 3) on a small NCHW input.
    N, Cin, H, W = 2, 3, 16, 16
    Cout, KH, KW = 6, 3, 3

    x = jax.random.normal(k_x, (N, Cin, H, W), dtype=jnp.float32)

    # Deterministic init mimicking PyTorch Conv2d default: U(-k, k), k = 1/sqrt(Cin*KH*KW)
    fan_in = Cin * KH * KW
    bound = 1.0 / (fan_in ** 0.5)
    weight = jax.random.uniform(k_w, (Cout, Cin, KH, KW), jnp.float32, -bound, bound)
    bias = jax.random.uniform(k_b, (Cout,), jnp.float32, -bound, bound)

    out = jax.jit(conv2d_pallas)(x, weight, bias)
    out = jax.block_until_ready(out)

    # Reference check against XLA's convolution (same NCHW / OIHW convention).
    ref = lax.conv_general_dilated(
        x, weight, window_strides=(1, 1), padding="VALID",
        dimension_numbers=("NCHW", "OIHW", "NCHW"),
        precision=lax.Precision.HIGHEST,
    ) + bias[None, :, None, None]

    assert out.shape == (N, Cout, H - KH + 1, W - KW + 1)
    assert jnp.allclose(out, ref, atol=1e-4, rtol=1e-4), "mismatch vs reference conv"

    print("KERNEL_OK")
</pallas_src>

<mosaic_0001>
module attributes {stable_mosaic.version = 11 : i64} {
  func.func @_conv_matmul_kernel(%arg0: i32, %arg1: memref<32x512xf32, #tpu.memory_space<vmem>>, %arg2: memref<8x32xf32, #tpu.memory_space<vmem>>, %arg3: memref<8x1xf32, #tpu.memory_space<vmem>>, %arg4: memref<8x512xf32, #tpu.memory_space<vmem>>) attributes {dimension_semantics = [#tpu.dimension_semantics<parallel>], iteration_bounds = array<i64: 1>, scalar_prefetch = 0 : i64, scratch_operands = 0 : i64, tpu.core_type = #tpu.core_type<tc>, window_params = [{transform_indices = @transform_0, window_bounds = array<i64: 32, 512>}, {pipeline_mode = #tpu.pipeline_mode<synchronous>, transform_indices = @transform_1, window_bounds = array<i64: 8, 32>}, {pipeline_mode = #tpu.pipeline_mode<synchronous>, transform_indices = @transform_2, window_bounds = array<i64: 8, 1>}, {transform_indices = @transform_3, window_bounds = array<i64: 8, 512>}]} {
    %c0 = arith.constant 0 : index
    %c0_0 = arith.constant 0 : index
    %0 = vector.load %arg2[%c0, %c0_0] : memref<8x32xf32, #tpu.memory_space<vmem>>, vector<8x32xf32>
    %c0_1 = arith.constant 0 : index
    %c0_2 = arith.constant 0 : index
    %1 = vector.load %arg1[%c0_1, %c0_2] : memref<32x512xf32, #tpu.memory_space<vmem>>, vector<32x512xf32>
    %cst = arith.constant dense<0.000000e+00> : vector<8x512xf32>
    %2 = tpu.matmul %0, %1, %cst {dimension_numbers = #tpu.dot_dimension_numbers<[1], [0], [0], [1], [0, 0, 1, 1], [], []>, precision = #tpu.contract_precision<fp32>} : vector<8x32xf32>, vector<32x512xf32>, vector<8x512xf32> -> vector<8x512xf32>
    %c0_3 = arith.constant 0 : index
    %c0_4 = arith.constant 0 : index
    %3 = vector.load %arg3[%c0_3, %c0_4] : memref<8x1xf32, #tpu.memory_space<vmem>>, vector<8x1xf32>
    %4 = vector.broadcast %3 : vector<8x1xf32> to vector<8x512xf32>
    %5 = arith.addf %2, %4 : vector<8x512xf32>
    %c0_5 = arith.constant 0 : index
    %c0_6 = arith.constant 0 : index
    %6 = vector.load %arg4[%c0_5, %c0_6] : memref<8x512xf32, #tpu.memory_space<vmem>>, vector<8x512xf32>
    tpu.vector_store %arg4[%c0_5, %c0_6], %5 {strides = array<i32>} : memref<8x512xf32, #tpu.memory_space<vmem>>, vector<8x512xf32>,
    return
  }
  func.func @transform_0(%arg0: i32) -> (i32, i32) {
    %c0_i32 = arith.constant 0 : i32
    %c0_i32_0 = arith.constant 0 : i32
    return %c0_i32, %arg0 : i32, i32
  }
  func.func @transform_1(%arg0: i32) -> (i32, i32) {
    %c0_i32 = arith.constant 0 : i32
    %c0_i32_0 = arith.constant 0 : i32
    %c0_i32_1 = arith.constant 0 : i32
    return %c0_i32, %c0_i32_0 : i32, i32
  }
  func.func @transform_2(%arg0: i32) -> (i32, i32) {
    %c0_i32 = arith.constant 0 : i32
    %c0_i32_0 = arith.constant 0 : i32
    %c0_i32_1 = arith.constant 0 : i32
    return %c0_i32, %c0_i32_0 : i32, i32
  }
  func.func @transform_3(%arg0: i32) -> (i32, i32) {
    %c0_i32 = arith.constant 0 : i32
    %c0_i32_0 = arith.constant 0 : i32
    return %c0_i32, %arg0 : i32, i32
  }
}

</mosaic_0001>

<bundles_post_ra>
// kernel: conv2d_pallas.1
= control target key start
LH: loop header
LB: loop body
LE: loop exit
PB: predicated region body
PF: predicated region fallthrough
CT: control target
= control target key end

     0   :  { %vm37_vm0 = vcmask 261120   ;;  %v791_v3 = vmov 0   ;;  %s1091_s0 = inlined_call_operand.vmem [shape: f32[32,512], index: 0, kind: input, shape index: {}]   ;;  %s1092_s1 = inlined_call_operand.vmem [shape: f32[8,32], index: 1, kind: input, shape index: {}]   ;;  %s1093_s2 = inlined_call_operand.vmem [shape: f32[8,1], index: 2, kind: input, shape index: {}]   ;;  %s1094_s3 = inlined_call_operand.vmem [shape: f32[8,512], index: 3, kind: output, shape index: {}]  }
   0x1   :  { %v27_v0 = vld [vmem:[%s1091_s0 + $0x60] sm:$0xff]  ;;  %790 = vset.pattern.permute.xlu0 %v791_v3  ;;  %v28_v9 = vld [vmem:[%s1091_s0 + $0x68] sm:$0xff]  ;;  %v29_v54 = vld [vmem:[%s1091_s0 + $0x70] sm:$0xff] }
   0x2   :  { %v23_v1 = vld [vmem:[%s1091_s0 + $0x40] sm:$0xff]  ;;  %v821_v4 = vand.u32 4294901760, %v27_v0  ;;  %v838_v12 = vand.u32 4294901760, %v28_v9  ;;  %v24_v13 = vld [vmem:[%s1091_s0 + $0x48] sm:$0xff]  ;;  %v25_v57 = vld [vmem:[%s1091_s0 + $0x50] sm:$0xff]  ;;  %v926_v58 = vand.u32 4294901760, %v29_v54 }
   0x3   :  { %v19_v2 = vld [vmem:[%s1091_s0 + $0x20] sm:$0xff]  ;;  %v823_v5 = vand.u32 4294901760, %v23_v1  ;;  %v20_v14 = vld [vmem:[%s1091_s0 + $0x28] sm:$0xff]  ;;  %v864_v22 = vand.u32 4294901760, %v24_v13  ;;  %v21_v60 = vld [vmem:[%s1091_s0 + $0x30] sm:$0xff]  ;;  %v934_v61 = vand.u32 4294901760, %v25_v57 }
   0x4   :  { %v825_v6 = vand.u32 4294901760, %v19_v2  ;;  %v15_v7 = vld [vmem:[%s1091_s0] sm:$0xff]  ;;  %v83_v15 = vsub.f32 %v27_v0, %v821_v4  ;;  %54 = vmatpush.msra.mxu0 %v821_v4  ;;  %154 = vmatpush.msra.mxu3 %v821_v4  ;;  %v16_v19 = vld [vmem:[%s1091_s0 + $0x8] sm:$0xff]  ;;  %v867_v23 = vsub.f32 %v28_v9, %v838_v12  ;;  %v869_v24 = vand.u32 4294901760, %v20_v14  ;;  %v17_v0 = vld [vmem:[%s1091_s0 + $0x10] sm:$0xff] }
   0x5   :  { %v14_v8 = vld [vmem:[%s1092_s1] sm:$0xff]  ;;  %v836_v10 = vand.u32 4294901760, %v15_v7  ;;  %v89_v16 = vsub.f32 %v23_v1, %v823_v5  ;;  %v880_v31 = vsub.f32 %v24_v13, %v864_v22  ;;  %v882_v32 = vand.u32 4294901760, %v16_v19  ;;  %v22_v9 = vld [vmem:[%s1091_s0 + $0x38] sm:$0xff] }
   0x6   :  { %v39_v11 = vsel %vm37_vm0, %v14_v8, 0  ;;  %v851_v17 = vsub.f32 %v19_v2, %v825_v6  ;;  %v31_v20 = vld [vmem:[%s1093_s2] sm:$0xff]  ;;  %125 = vmatpush.msra.mxu2 %v83_v15  ;;  %56 = vmatpush.msra.mxu0 %v823_v5  ;;  %v84_v25 = vand.u32 4294901760, %v83_v15  ;;  %v269_v29 = vand.u32 4294901760, %v867_v23  ;;  %v30_v2 = vld [vmem:[%s1091_s0 + $0x78] sm:$0xff] }
   0x7   :  { %v853_v18 = vand.u32 4294901760, %v39_v11  ;;  %v862_v21 = vsub.f32 %v15_v7, %v836_v10  ;;  %34 = vperm.xlu0 %790, %v31_v20   ;;  %v90_v26 = vand.u32 4294901760, %v89_v16  ;;  %156 = vmatpush.msra.mxu3 %v823_v5  ;;  %v275_v38 = vand.u32 4294901760, %v880_v31 }
   0x8   :  { %v96_v28 = vand.u32 4294901760, %v851_v17  ;;  %128 = vmatpush.msra.mxu2 %v89_v16  ;;  %v85_v33 = vsub.f32 %v83_v15, %v84_v25  ;;  %58 = vmatpush.msra.mxu0 %v825_v6  ;;  %v270_v37 = vsub.f32 %v867_v23, %v269_v29  ;;  %v895_v39 = vsub.f32 %v20_v14, %v869_v24  ;;  %v18_v14 = vld [vmem:[%s1091_s0 + $0x18] sm:$0xff] }
   0x9   :  { %v873_v27 = vsub.f32 %v39_v11, %v853_v18  ;;  %v102_v30 = vand.u32 4294901760, %v862_v21  ;;  %v91_v34 = vsub.f32 %v89_v16, %v90_v26  ;;  %158 = vmatpush.msra.mxu3 %v825_v6  ;;  %v276_v45 = vsub.f32 %v880_v31, %v275_v38 }
   0xa   :  { %v97_v35 = vsub.f32 %v851_v17, %v96_v28  ;;  %v86_v40 = vand.u32 4294901760, %v85_v33  ;;  %131 = vmatpush.msra.mxu2 %v851_v17  ;;  %60 = vmatpush.msra.mxu0 %v836_v10  ;;  %v271_v44 = vand.u32 4294901760, %v270_v37  ;;  %v281_v46 = vand.u32 4294901760, %v895_v39 }
   0xb   :  { %v887_v36 = vand.u32 4294901760, %v873_v27  ;;  %v92_v41 = vand.u32 4294901760, %v91_v34  ;;  %v103_v43 = vsub.f32 %v862_v21, %v102_v30  ;;  %160 = vmatpush.msra.mxu3 %v836_v10  ;;  %v909_v49 = vsub.f32 %v16_v19, %v882_v32 }
   0xc   :  { %183 = vmatpush.msrb.mxu0 %v84_v25  ;;  %87 = vmatpush.msra.mxu1 %v86_v40  ;;  %v98_v47 = vand.u32 4294901760, %v97_v35  ;;  %v277_v50 = vand.u32 4294901760, %v276_v45  ;;  %v282_v51 = vsub.f32 %v895_v39, %v281_v46  ;;  %v939_v62 = vsub.f32 %v29_v54, %v926_v58 }
   0xd   :  { %v64_v42 = vsub.f32 %v873_v27, %v887_v36  ;;  %134 = vmatpush.msra.mxu2 %v862_v21  ;;  %164 = vmatmul.f32.vlgmr.msra.gmra.mxu3 %v887_v36  ;;  %v104_v52 = vand.u32 4294901760, %v103_v43  ;;  %v287_v53 = vand.u32 4294901760, %v909_v49  ;;  %v941_v63 = vand.u32 4294901760, %v21_v60 }
   0xe   :  { %137 = vmatmul.f32.vlgmr.msra.gmra.mxu2 %v873_v27  ;;  %93 = vmatpush.msra.mxu1 %v92_v41  ;;  %v283_v56 = vand.u32 4294901760, %v282_v51  ;;  %v951_v1 = vsub.f32 %v25_v57, %v934_v61  ;;  %v958_v3 = vand.u32 4294901760, %v17_v0  ;;  %v970_v7 = vand.u32 4294901760, %v30_v2 }
   0xf   :  { %v906_v48 = vand.u32 4294901760, %v64_v42  ;;  %239 = vmatpush.msrb.mxu2 %v838_v12  ;;  %272 = vmatpush.msrb.mxu3 %v271_v44  ;;  %v288_v55 = vsub.f32 %v909_v49, %v287_v53  ;;  %v997_v16 = vand.u32 4294901760, %v22_v9  ;;  %v1010_v21 = vand.u32 4294901760, %v18_v14 }
  0x10   :  { %99 = vmatpush.msra.mxu1 %v98_v47  ;;  %187 = vmatpush.msrb.mxu0 %v90_v26  ;;  %v460_v8 = vand.u32 4294901760, %v951_v1  ;;  %v995_v15 = vsub.f32 %v30_v2, %v970_v7 }
  0x11   :  { %66 = vmatmul.f32.vlgmr.msra.gmra.mxu0 %v906_v48  ;;  %241 = vmatpush.msrb.mxu2 %v864_v22  ;;  %v289_v59 = vand.u32 4294901760, %v288_v55  ;;  %v1021_v25 = vsub.f32 %v22_v9, %v997_v16 }
  0x12   :  { %278 = vmatpush.msrb.mxu3 %v277_v50  ;;  %105 = vmatpush.msra.mxu1 %v104_v52  ;;  %v461_v17 = vsub.f32 %v951_v1, %v460_v8 }
  0x13   :  { %243 = vmatpush.msrb.mxu2 %v869_v24  ;;  %107 = vmatmul.f32.vlgmr.msra.gmra.mxu1 %v853_v18  ;;  %v651_v33 = vand.u32 4294901760, %v1021_v25 }
  0x14   :  { %191 = vmatpush.msrb.mxu0 %v96_v28  ;;  %214 = vmatpush.msrb.mxu1 %v821_v4  ;;  %v454_v4 = vand.u32 4294901760, %v939_v62  ;;  %v462_v26 = vand.u32 4294901760, %v461_v17 }
  0x15   :  { %245 = vmatpush.msrb.mxu2 %v882_v32  ;;  %284 = vmatpush.msrb.mxu3 %v283_v56 }
  0x16   :  { %195 = vmatpush.msrb.mxu0 %v102_v30  ;;  %216 = vmatpush.msrb.mxu1 %v823_v5  ;;  %v963_v5 = vsub.f32 %v21_v60, %v941_v63  ;;  %v656_v30 = vsub.f32 %v18_v14, %v1010_v21 }
  0x17   :  { %251 = vmatmul.f32.vlgmr.msrb.gmra.mxu2 %v906_v48  ;;  %290 = vmatpush.msrb.mxu3 %v289_v59 }
  0x18   :  { %368 = vmatpush.msra.mxu2 %v269_v29  ;;  %218 = vmatpush.msrb.mxu1 %v825_v6  ;;  %v26_v6 = vld [vmem:[%s1091_s0 + $0x58] sm:$0xff]  ;;  %v466_v13 = vand.u32 4294901760, %v963_v5  ;;  %v657_v37 = vand.u32 4294901760, %v656_v30 }
  0x19   :  { %197 = vmatmul.f32.vlgmr.msrb.gmra.mxu0 %v853_v18  ;;  %292 = vmatmul.f32.vlgmr.msrb.gmra.mxu3 %v853_v18  ;;  %v982_v11 = vand.u32 4294901760, %v26_v6 }
  0x1a   :  { %310 = vmatpush.msra.mxu0 %v867_v23  ;;  %220 = vmatpush.msrb.mxu1 %v836_v10  ;;  %v980_v10 = vsub.f32 %v17_v0, %v958_v3  ;;  %v467_v23 = vsub.f32 %v963_v5, %v466_v13  ;;  %v658_v41 = vsub.f32 %v656_v30, %v657_v37 }
  0x1b   :  { %372 = vmatpush.msra.mxu2 %v275_v38  ;;  %399 = vmatpush.msra.mxu3 %v838_v12  ;;  %v1008_v20 = vsub.f32 %v26_v6, %v982_v11 }
  0x1c   :  { %222 = vmatmul.f32.vlgmr.msrb.gmra.mxu1 %v853_v18  ;;  %313 = vmatpush.msra.mxu0 %v880_v31  ;;  %v472_v19 = vand.u32 4294901760, %v980_v10  ;;  %v468_v31 = vand.u32 4294901760, %v467_v23  ;;  %v659_v43 = vand.u32 4294901760, %v658_v41 }
  0x1d   :  { %339 = vmatpush.msra.mxu1 %v838_v12  ;;  %376 = vmatpush.msra.mxu2 %v281_v46  ;;  %v455_v12 = vsub.f32 %v939_v62, %v454_v4  ;;  %v645_v29 = vand.u32 4294901760, %v1008_v20 }
  0x1e   :  { %401 = vmatpush.msra.mxu3 %v864_v22  ;;  %316 = vmatpush.msra.mxu0 %v895_v39  ;;  %v473_v28 = vsub.f32 %v980_v10, %v472_v19  ;;  %v652_v39 = vsub.f32 %v1021_v25, %v651_v33 }
  0x1f   :  { %341 = vmatpush.msra.mxu1 %v864_v22  ;;  %380 = vmatpush.msra.mxu2 %v287_v53  ;;  %v456_v22 = vand.u32 4294901760, %v455_v12  ;;  %v646_v35 = vsub.f32 %v1008_v20, %v645_v29 }
  0x20   :  { %403 = vmatpush.msra.mxu3 %v869_v24  ;;  %319 = vmatpush.msra.mxu0 %v909_v49  ;;  %v474_v34 = vand.u32 4294901760, %v473_v28  ;;  %v653_v42 = vand.u32 4294901760, %v652_v39 }
  0x21   :  { %343 = vmatpush.msra.mxu1 %v869_v24  ;;  %382 = vmatmul.f32.vlgmr.msra.gmra.mxu2 %v853_v18  ;;  %v639_v24 = vand.u32 4294901760, %v995_v15  ;;  %v647_v40 = vand.u32 4294901760, %v646_v35 }
  0x22   :  { %405 = vmatpush.msra.mxu3 %v882_v32  ;;  %495 = vmatpush.msrb.mxu2 %v939_v62 }
  0x23   :  { %322 = vmatmul.f32.vlgmr.msra.gmra.mxu0 %v873_v27  ;;  %345 = vmatpush.msra.mxu1 %v882_v32  ;;  %v640_v32 = vsub.f32 %v995_v15, %v639_v24 }
  0x24   :  { %407 = vmatmul.f32.vlgmr.msra.gmra.mxu3 %v853_v18  ;;  %424 = vmatpush.msrb.mxu0 %v926_v58 }
  0x25   :  { %498 = vmatpush.msrb.mxu2 %v951_v1  ;;  %524 = vmatpush.msrb.mxu3 %v926_v58  ;;  %v641_v38 = vand.u32 4294901760, %v640_v32 }
  0x26   :  { %349 = vmatmul.f32.vlgmr.msra.gmra.mxu1 %v887_v36  ;;  %426 = vmatpush.msrb.mxu0 %v934_v61 }
  0x27   :  { %457 = vmatpush.msrb.mxu1 %v456_v22  ;;  %501 = vmatpush.msrb.mxu2 %v963_v5 }
  0x28   :  { %526 = vmatpush.msrb.mxu3 %v934_v61  ;;  %428 = vmatpush.msrb.mxu0 %v941_v63 }
  0x29   :  { %463 = vmatpush.msrb.mxu1 %v462_v26  ;;  %504 = vmatpush.msrb.mxu2 %v980_v10 }
  0x2a   :  { %528 = vmatpush.msrb.mxu3 %v941_v63  ;;  %430 = vmatpush.msrb.mxu0 %v958_v3 }
  0x2b   :  { %469 = vmatpush.msrb.mxu1 %v468_v31  ;;  %507 = vmatmul.f32.vlgmr.msrb.gmra.mxu2 %v873_v27 }
  0x2c   :  { %530 = vmatpush.msrb.mxu3 %v958_v3  ;;  %609 = vmatpush.msra.mxu2 %v970_v7 }
  0x2d   :  { %436 = vmatmul.f32.vlgmr.msrb.gmra.mxu0 %v906_v48  ;;  %475 = vmatpush.msrb.mxu1 %v474_v34 }
  0x2e   :  { %534 = vmatmul.f32.vlgmr.msrb.gmra.mxu3 %v887_v36  ;;  %553 = vmatpush.msra.mxu0 %v454_v4 }
  0x2f   :  { %611 = vmatpush.msra.mxu2 %v982_v11  ;;  %642 = vmatpush.msra.mxu3 %v641_v38 }
  0x30   :  { %477 = vmatmul.f32.vlgmr.msrb.gmra.mxu1 %v853_v18  ;;  %557 = vmatpush.msra.mxu0 %v460_v8 }
  0x31   :  { %584 = vmatpush.msra.mxu1 %v926_v58  ;;  %613 = vmatpush.msra.mxu2 %v997_v16 }
  0x32   :  { %648 = vmatpush.msra.mxu3 %v647_v40  ;;  %561 = vmatpush.msra.mxu0 %v466_v13 }
  0x33   :  { %586 = vmatpush.msra.mxu1 %v934_v61  ;;  %615 = vmatpush.msra.mxu2 %v1010_v21 }
  0x34   :  { %654 = vmatpush.msra.mxu3 %v653_v42  ;;  %565 = vmatpush.msra.mxu0 %v472_v19 }
  0x35   :  { %588 = vmatpush.msra.mxu1 %v941_v63  ;;  %621 = vmatmul.f32.vlgmr.msra.gmra.mxu2 %v906_v48 }
  0x36   :  { %660 = vmatpush.msra.mxu3 %v659_v43  ;;  %738 = vmatpush.msrb.mxu2 %v639_v24 }
  0x37   :  { %567 = vmatmul.f32.vlgmr.msra.gmra.mxu0 %v853_v18  ;;  %590 = vmatpush.msra.mxu1 %v958_v3 }
  0x38   :  { %662 = vmatmul.f32.vlgmr.msra.gmra.mxu3 %v853_v18  ;;  %680 = vmatpush.msrb.mxu0 %v995_v15 }
  0x39   :  { %742 = vmatpush.msrb.mxu2 %v645_v29  ;;  %769 = vmatpush.msrb.mxu3 %v970_v7 }
  0x3a   :  { %592 = vmatmul.f32.vlgmr.msra.gmra.mxu1 %v853_v18  ;;  %683 = vmatpush.msrb.mxu0 %v1008_v20 }
  0x3b   :  { %709 = vmatpush.msrb.mxu1 %v970_v7  ;;  %746 = vmatpush.msrb.mxu2 %v651_v33 }
  0x3c   :  { %771 = vmatpush.msrb.mxu3 %v982_v11  ;;  %686 = vmatpush.msrb.mxu0 %v1021_v25 }
  0x3d   :  { %711 = vmatpush.msrb.mxu1 %v982_v11  ;;  %750 = vmatpush.msrb.mxu2 %v657_v37 }
  0x3e   :  { %773 = vmatpush.msrb.mxu3 %v997_v16  ;;  %689 = vmatpush.msrb.mxu0 %v656_v30 }
  0x3f   :  { %713 = vmatpush.msrb.mxu1 %v997_v16  ;;  %752 = vmatmul.f32.vlgmr.msrb.gmra.mxu2 %v853_v18 }
  0x40   :  { %775 = vmatpush.msrb.mxu3 %v1010_v21  ;;  %692 = vmatmul.f32.vlgmr.msrb.gmra.mxu0 %v873_v27 }
  0x41   :  { %715 = vmatpush.msrb.mxu1 %v1010_v21  ;;  %777 = vmatmul.f32.vlgmr.msrb.gmra.mxu3 %v853_v18 }
  0x42   :  { %719 = vmatmul.f32.vlgmr.msrb.gmra.mxu1 %v887_v36 }
  0x79   :  { %v35_v44 = vpop.permute.xlu0 %34 }
  0x8e   :  { %v67_v45 = vpop.f32.mrf.mxu0 }
  0x8f   :  { %v68_v46 = vadd.f32 %v67_v45, %v35_v44 }
  0x90   :  { %v108_v47 = vpop.f32.mrf.mxu1  ;;  %v165_v50 = vpop.f32.mrf.mxu3 }
  0x91   :  { %v138_v48 = vpop.f32.mrf.mxu2  ;;  %v109_v49 = vadd.f32 %v108_v47, %v68_v46 }
  0x93   :  { %v139_v51 = vadd.f32 %v138_v48, %v109_v49 }
  0x95   :  { %v166_v52 = vadd.f32 %v165_v50, %v139_v51 }
  0x96   :  { %v198_v53 = vpop.f32.mrf.mxu0 }
  0x97   :  { %v199_v54 = vadd.f32 %v198_v53, %v166_v52 }
  0x99   :  { %v223_v55 = vpop.f32.mrf.mxu1 }
  0x9a   :  { %v224_v56 = vadd.f32 %v223_v55, %v199_v54  ;;  %v252_v27 = vpop.f32.mrf.mxu2 }
  0x9b   :  { %v253_v57 = vadd.f32 %v252_v27, %v35_v44 }
  0x9c   :  { %781 = vst [vmem:[%s1094_s3] sm:$0xff] %v224_v56  ;;  %v293_v18 = vpop.f32.mrf.mxu3 }
  0x9d   :  { %v294_v36 = vadd.f32 %v293_v18, %v253_v57 }
  0xa0   :  { %v323_v58 = vpop.f32.mrf.mxu0 }
  0xa1   :  { %v324_v59 = vadd.f32 %v323_v58, %v294_v36 }
  0xa3   :  { %v350_v60 = vpop.f32.mrf.mxu1 }
  0xa4   :  { %v351_v61 = vadd.f32 %v350_v60, %v324_v59  ;;  %v383_v62 = vpop.f32.mrf.mxu2 }
  0xa6   :  { %v384_v63 = vadd.f32 %v383_v62, %v351_v61 }
  0xa7   :  { %v408_v0 = vpop.f32.mrf.mxu3 }
  0xa8   :  { %v409_v1 = vadd.f32 %v408_v0, %v384_v63 }
  0xaa   :  { %782 = vst [vmem:[%s1094_s3 + $0x8] sm:$0xff] %v409_v1  ;;  %v437_v2 = vpop.f32.mrf.mxu0 }
  0xab   :  { %v438_v3 = vadd.f32 %v437_v2, %v35_v44 }
  0xad   :  { %v478_v4 = vpop.f32.mrf.mxu1 }
  0xae   :  { %v479_v5 = vadd.f32 %v478_v4, %v438_v3  ;;  %v508_v6 = vpop.f32.mrf.mxu2 }
  0xb0   :  { %v509_v7 = vadd.f32 %v508_v6, %v479_v5 }
  0xb1   :  { %v535_v8 = vpop.f32.mrf.mxu3 }
  0xb2   :  { %v536_v9 = vadd.f32 %v535_v8, %v509_v7 }
  0xb4   :  { %v568_v10 = vpop.f32.mrf.mxu0 }
  0xb5   :  { %v569_v11 = vadd.f32 %v568_v10, %v536_v9 }
  0xb7   :  { %v593_v12 = vpop.f32.mrf.mxu1 }
  0xb8   :  { %v594_v13 = vadd.f32 %v593_v12, %v569_v11  ;;  %v622_v14 = vpop.f32.mrf.mxu2 }
  0xb9   :  { %v623_v15 = vadd.f32 %v622_v14, %v35_v44 }
  0xba   :  { %783 = vst [vmem:[%s1094_s3 + $0x10] sm:$0xff] %v594_v13 }
  0xbb   :  { %v663_v16 = vpop.f32.mrf.mxu3 }
  0xbc   :  { %v664_v17 = vadd.f32 %v663_v16, %v623_v15 }
  0xbd   :  { %v693_v19 = vpop.f32.mrf.mxu0 }
  0xbe   :  { %v694_v20 = vadd.f32 %v693_v19, %v664_v17 }
  0xbf   :  { %v720_v21 = vpop.f32.mrf.mxu1 }
  0xc0   :  { %v721_v22 = vadd.f32 %v720_v21, %v694_v20 }
  0xc2   :  { %v753_v23 = vpop.f32.mrf.mxu2 }
  0xc3   :  { %v754_v24 = vadd.f32 %v753_v23, %v721_v22 }
  0xc4   :  { %v778_v25 = vpop.f32.mrf.mxu3 }
  0xc5   :  { %v779_v26 = vadd.f32 %v778_v25, %v754_v24 }
  0xc7   :  { %784 = vst [vmem:[%s1094_s3 + $0x18] sm:$0xff] %v779_v26 }

</bundles_post_ra>
